<compile_context>
chip_gen: v5e
topology: v5e:2x2
jax: 0.10.0
libtpu: 0.0.40
codegen_flags: <defaults>
</compile_context>

<pallas_src>
import functools

import jax
import jax.numpy as jnp
from jax import lax
from jax.experimental import pallas as pl
from jax.experimental.pallas import tpu as pltpu


def _round_up(x, m):
    return ((x + m - 1) // m) * m


def _choose_tile_s(s, row_bytes, budget=6 << 20):
    """Largest divisor of `s` whose padded VMEM footprint fits the budget."""
    cands = [t for t in (512, 256, 128, 64, 32, 16, 8, 4, 2, 1)
             if t <= s and s % t == 0]
    for t in cands:
        if t * row_bytes <= budget:
            return t
    return cands[-1]


# --------------------------------------------------------------------------
# Kernel 1: farthest point sampling (state resident in VMEM, one launch/batch)
# --------------------------------------------------------------------------
def _fps_kernel(init_ref, xt_ref, xsq_ref, cent_ref, dist_ref, *, npoint, n):
    xt = xt_ref[0]                                        # (8, N)  lane-dense coords
    xsq = xsq_ref[0]                                      # (1, N)  ||x||^2 (precomputed)
    iota_n = lax.broadcasted_iota(jnp.int32, (1, n), 1)
    dist_ref[...] = jnp.full((1, n), 1e10, jnp.float32)   # running min-distance (scratch)
    far0 = init_ref[0]                                    # (1, 1) int32

    def body(i, far):
        # record selected index: dynamic sublane store, no O(npoint) select.
        cent_ref[0, pl.ds(i, 1), :] = far
        # centroid coordinates via masked lane-reduce (no MXU round trip).
        onehot = iota_n == far                            # (1, N) bool
        crow = jnp.sum(jnp.where(onehot, xt, 0.0), axis=1, keepdims=True)   # (8, 1)
        cross = jnp.sum(crow * xt, axis=0, keepdims=True)                   # (1, N)
        csq = jnp.sum(crow * crow, axis=0, keepdims=True)                   # (1, 1)
        d = xsq - 2.0 * cross + csq                       # ||x - c||^2 (lane-dense)
        dist = jnp.minimum(dist_ref[...], d)
        dist_ref[...] = dist
        mx = jnp.max(dist, axis=1, keepdims=True)         # (1, 1)
        far_new = jnp.min(jnp.where(dist == mx, iota_n, jnp.int32(n)),
                          axis=1, keepdims=True)          # first max index
        return far_new

    lax.fori_loop(0, npoint, body, far0)


def farthest_point_sample_pallas(xyz, npoint, key):
    """Same semantics as the reference FPS ('slow' path), deterministic seed."""
    B, N, C = xyz.shape
    Cp = 8                                                # pad 5 -> 8 sublanes
    x = xyz.astype(jnp.float32)
    xt = jnp.transpose(jnp.pad(x, ((0, 0), (0, 0), (0, Cp - C))),
                       (0, 2, 1))                         # (B, 8, N) lane-dense
    xsq = jnp.sum(x * x, axis=-1)[:, None, :]             # (B, 1, N) precomputed norms
    init = jax.random.randint(key, (B, 1, 1), 0, N, dtype=jnp.int32)
    out = pl.pallas_call(
        functools.partial(_fps_kernel, npoint=npoint, n=N),
        out_shape=jax.ShapeDtypeStruct((B, npoint, 1), jnp.int32),
        grid=(B,),
        in_specs=[
            pl.BlockSpec((1, 1, 1), lambda b: (b, 0, 0)),
            pl.BlockSpec((1, Cp, N), lambda b: (b, 0, 0)),
            pl.BlockSpec((1, 1, N), lambda b: (b, 0, 0)),
        ],
        out_specs=pl.BlockSpec((1, npoint, 1), lambda b: (b, 0, 0)),
        scratch_shapes=[pltpu.VMEM((1, N), jnp.float32)],
        compiler_params=pltpu.CompilerParams(dimension_semantics=("parallel",)),
    )(init, xt, xsq)
    return out[:, :, 0]                                   # (B, npoint) int32


# --------------------------------------------------------------------------
# Kernel 2: fused squared-distance + top-K neighbor selection
#   grid = (B, S_tiles, N_tiles); running top-K (vals, idx) lives in VMEM
#   scratch across the N axis ('arbitrary'); only (B, S, K) indices emitted.
#   Per-row constant ||q||^2 dropped (does not change per-row ordering).
# --------------------------------------------------------------------------
def _knn_kernel(q_ref, kt_ref, kn_ref, idx_ref, vscr, iscr,
                *, k, tn, n_valid, mask_cols):
    nt = pl.program_id(2)

    @pl.when(nt == 0)
    def _():
        vscr[...] = jnp.full(vscr.shape, jnp.inf, dtype=vscr.dtype)
        iscr[...] = jnp.zeros(iscr.shape, dtype=iscr.dtype)

    q = q_ref[0]                                          # (tS, 8)
    kt = kt_ref[0]                                        # (8, tN)  lane-dense
    kn = kn_ref[0]                                        # (1, tN)  ||x||^2
    d = kn - 2.0 * jnp.dot(q, kt, preferred_element_type=jnp.float32)  # (tS, tN)
    col = lax.broadcasted_iota(jnp.int32, d.shape, 1) + nt * tn
    if mask_cols:
        d = jnp.where(col < n_valid, d, jnp.inf)          # padded columns

    big = jnp.int32(2147483647)
    inf = jnp.float32(jnp.inf)

    # Phase 1: K smallest of this tile; d stays tN-wide (lane-aligned), the
    # running scratch is never concatenated with it.
    tv, ti = [], []
    for _ in range(k):
        m = jnp.min(d, axis=1, keepdims=True)             # (tS, 1)
        hit = d == m
        sel = jnp.min(jnp.where(hit, col, big), axis=1, keepdims=True)
        tv.append(m)
        ti.append(sel)
        d = jnp.where(col == sel, inf, d)                 # invalidate winner only
    tile_v = jnp.concatenate(tv, axis=1)                  # (tS, K)
    tile_i = jnp.concatenate(ti, axis=1)

    # Phase 2: merge tile top-K with running top-K (tiny (tS, 2K) arrays).
    cv = jnp.concatenate([vscr[...], tile_v], axis=1)
    ci = jnp.concatenate([iscr[...], tile_i], axis=1)
    vs, ii = [], []
    for _ in range(k):
        m = jnp.min(cv, axis=1, keepdims=True)
        hit = cv == m
        sel = jnp.min(jnp.where(hit, ci, big), axis=1, keepdims=True)
        vs.append(m)
        ii.append(sel)
        cv = jnp.where(hit & (ci == sel), inf, cv)
    new_i = jnp.concatenate(ii, axis=1)
    vscr[...] = jnp.concatenate(vs, axis=1)
    iscr[...] = new_i

    @pl.when(nt == pl.num_programs(2) - 1)                # write only once
    def _():
        idx_ref[0] = new_i


def knn_indices_pallas(new_xyz, xyz, k):
    B, S, C = new_xyz.shape
    _, N, _ = xyz.shape
    Cp = 8

    if S >= 256:
        tS = 256
    elif S >= 8:
        tS = _round_up(S, 8)
    else:
        tS = S
    S_pad = _round_up(S, tS)
    if N >= 128:
        tN = min(2048, _round_up(N, 128))                 # larger N-tiles: fewer grid steps
        N_pad = _round_up(N, tN)
    else:
        tN, N_pad = N, N

    q = jnp.pad(new_xyz.astype(jnp.float32),
                ((0, 0), (0, S_pad - S), (0, Cp - C)))            # (B, S_pad, 8)
    x = xyz.astype(jnp.float32)
    kt = jnp.transpose(jnp.pad(x, ((0, 0), (0, N_pad - N), (0, Cp - C))),
                       (0, 2, 1))                                  # (B, 8, N_pad)
    kn = jnp.pad(jnp.sum(x * x, axis=-1),
                 ((0, 0), (0, N_pad - N)))[:, None, :]             # (B, 1, N_pad)

    grid = (B, S_pad // tS, N_pad // tN)
    kern = functools.partial(_knn_kernel, k=k, tn=tN, n_valid=N,
                             mask_cols=(N_pad != N))
    idx = pl.pallas_call(
        kern,
        out_shape=jax.ShapeDtypeStruct((B, S_pad, k), jnp.int32),
        grid=grid,
        in_specs=[
            pl.BlockSpec((1, tS, Cp), lambda b, s, n: (b, s, 0)),
            pl.BlockSpec((1, Cp, tN), lambda b, s, n: (b, 0, n)),
            pl.BlockSpec((1, 1, tN), lambda b, s, n: (b, 0, n)),
        ],
        out_specs=pl.BlockSpec((1, tS, k), lambda b, s, n: (b, s, 0)),
        scratch_shapes=[pltpu.VMEM((tS, k), jnp.float32),
                        pltpu.VMEM((tS, k), jnp.int32)],
        compiler_params=pltpu.CompilerParams(
            dimension_semantics=("parallel", "parallel", "arbitrary")),
    )(q, kt, kn)
    return idx[:, :S, :]                                           # (B, S, K)


# --------------------------------------------------------------------------
# Kernel 3 (two passes, S-tiled): normalize ('center'/'anchor') + affine +
# broadcast-concat of new_points, with the cross-tile std done in pass 1.
# --------------------------------------------------------------------------
def _group_stats_kernel(*refs, anchor):
    if anchor:
        g_ref, anc_ref, s1_ref, ssq_ref = refs
    else:
        g_ref, s1_ref, ssq_ref = refs
    s = pl.program_id(1)

    @pl.when(s == 0)
    def _():
        s1_ref[...] = jnp.zeros(s1_ref.shape, s1_ref.dtype)
        ssq_ref[...] = jnp.zeros(ssq_ref.shape, ssq_ref.dtype)

    g = g_ref[0]                                          # (tS, K, Cf)
    if anchor:
        mean = anc_ref[0]                                 # (tS, 1, Cf)
    else:
        mean = jnp.mean(g, axis=1, keepdims=True)         # per-group mean over K
    dg = g - mean

    sq = jnp.sum(dg * dg, axis=2)                         # (tS, K)
    sq = jnp.sum(sq, axis=1, keepdims=True)               # (tS, 1)
    ssq_ref[0] += jnp.sum(sq, axis=0, keepdims=True)      # (1, 1)
    if anchor:                                            # center-mode dev sum is exactly 0
        s1 = jnp.sum(dg, axis=2)
        s1 = jnp.sum(s1, axis=1, keepdims=True)
        s1_ref[0] += jnp.sum(s1, axis=0, keepdims=True)


def _norm_affine_concat_kernel(g_ref, anc_ref, scale_ref, beta_ref, out_ref,
                               *, d_feat, cf, anchor):
    g = g_ref[0]                                          # (tS, K, Cf)
    anc = anc_ref[0]                                      # (tS, 1, Cf)
    if anchor:
        mean = anc
    else:
        mean = jnp.mean(g, axis=1, keepdims=True)
    dg = g - mean
    scale = scale_ref[...]                                # (1, 1, Cf) = alpha * inv_std
    beta = beta_ref[...]                                  # (1, 1, Cf)

    # Direct lane-slice stores: no concatenated temp slab in VMEM.
    out_ref[0, :, :, 0:cf] = dg * scale + beta
    ts, kk = g.shape[0], g.shape[1]
    rep = jnp.broadcast_to(anc[:, :, 0:d_feat], (ts, kk, d_feat))
    out_ref[0, :, :, cf:] = rep


def fused_normalize_concat(grouped, anchor_feat, alpha, beta, d_feat, anchor_mode):
    """grouped [B,S,K,Cf] f32, anchor_feat [B,S,Cf] f32 -> [B,S,K,Cf+d_feat]."""
    B, S, K, Cf = grouped.shape
    Dout = Cf + d_feat
    anc4 = anchor_feat.reshape(B, S, 1, Cf)

    lane = lambda c: _round_up(c, 128)
    sub = lambda r: _round_up(r, 8)
    # padded VMEM bytes per S-row, incl. double-buffering of every operand
    row_bytes = 4 * (2 * sub(K) * lane(Cf)      # grouped tile
                     + 2 * 8 * lane(Cf)         # anchor tile
                     + 2 * sub(K) * lane(Dout))  # output tile
    tS = _choose_tile_s(S, row_bytes)
    grid = (B, S // tS)

    g_spec = pl.BlockSpec((1, tS, K, Cf), lambda b, s: (b, s, 0, 0))
    a_spec = pl.BlockSpec((1, tS, 1, Cf), lambda b, s: (b, s, 0, 0))
    stat_spec = pl.BlockSpec((1, 1, 1), lambda b, s: (b, 0, 0))

    # Pass 1: per-batch sum / sum-of-squares of centered values (tiny outputs).
    stats_in_specs = [g_spec] + ([a_spec] if anchor_mode else [])
    stats_args = (grouped,) + ((anc4,) if anchor_mode else ())
    s1, ssq = pl.pallas_call(
        functools.partial(_group_stats_kernel, anchor=anchor_mode),
        out_shape=(jax.ShapeDtypeStruct((B, 1, 1), jnp.float32),
                   jax.ShapeDtypeStruct((B, 1, 1), jnp.float32)),
        grid=grid,
        in_specs=stats_in_specs,
        out_specs=(stat_spec, stat_spec),
        compiler_params=pltpu.CompilerParams(
            dimension_semantics=("parallel", "arbitrary")),
    )(*stats_args)

    # Scalar epilogue (B values) in plain JAX: unbiased std (torch.std, ddof=1).
    n = jnp.float32(S * K * Cf)
    ssqv = ssq[:, 0, 0]
    if anchor_mode:
        # TODO(synk): single-pass (ssq - s1^2/n) can lose precision vs torch.std's
        # two-pass computation on very large slabs.
        s1v = s1[:, 0, 0]
        var = (ssqv - s1v * s1v / n) / (n - 1.0)
    else:
        var = ssqv / (n - 1.0)
    inv = 1.0 / (jnp.sqrt(jnp.maximum(var, 0.0)) + 1e-5)           # (B,)
    scale = alpha.reshape(1, 1, Cf) * inv[:, None, None]           # (B, 1, Cf)
    beta3 = beta.reshape(1, 1, Cf)                                 # (1, 1, Cf)

    # Pass 2: normalize + affine + broadcast-concat, fully tiled/pipelined.
    out = pl.pallas_call(
        functools.partial(_norm_affine_concat_kernel, d_feat=d_feat, cf=Cf,
                          anchor=anchor_mode),
        out_shape=jax.ShapeDtypeStruct((B, S, K, Dout), jnp.float32),
        grid=grid,
        in_specs=[g_spec, a_spec,
                  pl.BlockSpec((1, 1, Cf), lambda b, s: (b, 0, 0)),
                  pl.BlockSpec((1, 1, Cf), lambda b, s: (0, 0, 0))],
        out_specs=pl.BlockSpec((1, tS, K, Dout), lambda b, s: (b, s, 0, 0)),
        compiler_params=pltpu.CompilerParams(
            dimension_semantics=("parallel", "parallel")),
    )(grouped, anc4, scale, beta3)
    return out


# --------------------------------------------------------------------------
# Plain-JAX glue
# --------------------------------------------------------------------------
def index_points(points, idx):
    """points [B,N,C], idx [B, ...] -> [B, ..., C]"""
    B = points.shape[0]
    C = points.shape[-1]
    idx_flat = idx.reshape(B, -1)
    out = jnp.take_along_axis(points, idx_flat[..., None], axis=1)
    return out.reshape(idx.shape + (C,))


class LocalGrouperPallas:
    def __init__(self, channel, groups, kneighbors, use_xyz=True,
                 sample='fast', normalize='center'):
        self.groups = groups
        self.kneighbors = kneighbors
        self.use_xyz = use_xyz
        self.sample = sample
        self.normalize = normalize.lower() if normalize is not None else None
        if self.normalize not in ['center', 'anchor']:
            self.normalize = None
        if self.normalize is not None:
            add_channel = 5 if self.use_xyz else 0
            # nn.Parameter(torch.ones/zeros) -> deterministic init
            self.affine_alpha = jnp.ones((1, 1, 1, channel + add_channel), jnp.float32)
            self.affine_beta = jnp.zeros((1, 1, 1, channel + add_channel), jnp.float32)

    def __call__(self, xyz, points, key):
        B, N, C = xyz.shape
        S, K = self.groups, self.kneighbors
        D = points.shape[-1]

        # TODO(synk): 'uniform_joints' / 'resample' sampling modes are not ported;
        # 'fast' and 'slow' both map to the Pallas FPS kernel (same semantics).
        fps_idx = farthest_point_sample_pallas(xyz, S, key)            # (B, S)

        # Single pre-concatenated [points | xyz] source: one gather per index set.
        points_f = points.astype(jnp.float32)
        xyz_f = xyz.astype(jnp.float32)
        px = jnp.concatenate([points_f, xyz_f], axis=-1) if self.use_xyz else points_f

        anchor_feat = index_points(px, fps_idx)                        # (B, S, Cf)
        new_points = anchor_feat[..., :D]                              # (B, S, D)
        new_xyz = (anchor_feat[..., D:] if self.use_xyz
                   else index_points(xyz_f, fps_idx))                  # (B, S, 5)

        # Fused distance + top-K (indices only; no (B,S,N) matrix in HBM).
        idx = knn_indices_pallas(new_xyz, xyz_f, K)                    # (B, S, K)

        # TODO(synk): fuse this row gather into the normalize kernel via manual
        # DMA gather; it is the remaining large HBM round trip.
        grouped = index_points(px, idx)                                # (B, S, K, Cf)

        if self.normalize is not None:
            out_points = fused_normalize_concat(
                grouped, anchor_feat, self.affine_alpha, self.affine_beta,
                d_feat=D, anchor_mode=(self.normalize == 'anchor'))
        else:
            # TODO(synk): normalize=None path stays in plain JAX (concat only).
            rep = jnp.broadcast_to(new_points[:, :, None, :], (B, S, K, D))
            out_points = jnp.concatenate([grouped, rep], axis=-1)

        return new_xyz, out_points


if __name__ == "__main__":
    key = jax.random.PRNGKey(0)
    k_xyz, k_pts, k_fps = jax.random.split(key, 3)

    B, N, D = 2, 64, 16          # batch, points, feature channels
    S, K = 16, 8                 # groups, k-neighbors

    xyz = jax.random.normal(k_xyz, (B, N, 5), dtype=jnp.float32)
    points = jax.random.normal(k_pts, (B, N, D), dtype=jnp.float32)

    grouper = LocalGrouperPallas(channel=D, groups=S, kneighbors=K,
                                 use_xyz=True, sample='fast', normalize='center')
    new_xyz, new_points = grouper(xyz, points, k_fps)
    jax.block_until_ready((new_xyz, new_points))

    assert new_xyz.shape == (B, S, 5)
    assert new_points.shape == (B, S, K, (D + 5) + D)
    assert bool(jnp.all(jnp.isfinite(new_xyz)))
    assert bool(jnp.all(jnp.isfinite(new_points)))
    print("KERNEL_OK")
</pallas_src>

<mosaic_0001>
module attributes {stable_mosaic.version = 11 : i64} {
  func.func @_fps_kernel(%arg0: i32, %arg1: memref<1x1x1xi32, #tpu.memory_space<vmem>>, %arg2: memref<1x8x64xf32, #tpu.memory_space<vmem>>, %arg3: memref<1x1x64xf32, #tpu.memory_space<vmem>>, %arg4: memref<1x16x1xi32, #tpu.memory_space<vmem>>, %arg5: memref<1x64xf32, #tpu.memory_space<vmem>>) attributes {dimension_semantics = [#tpu.dimension_semantics<parallel>], iteration_bounds = array<i64: 2>, scalar_prefetch = 0 : i64, scratch_operands = 1 : i64, tpu.core_type = #tpu.core_type<tc>, window_params = [{transform_indices = @transform_0, window_bounds = array<i64: 1, 1, 1>}, {transform_indices = @transform_1, window_bounds = array<i64: 1, 8, 64>}, {transform_indices = @transform_2, window_bounds = array<i64: 1, 1, 64>}, {transform_indices = @transform_3, window_bounds = array<i64: 1, 16, 1>}]} {
    %c0 = arith.constant 0 : index
    %c0_0 = arith.constant 0 : index
    %c0_1 = arith.constant 0 : index
    %0 = vector.load %arg2[%c0, %c0_0, %c0_1] : memref<1x8x64xf32, #tpu.memory_space<vmem>>, vector<1x8x64xf32>
    %1 = vector.shape_cast %0 : vector<1x8x64xf32> to vector<8x64xf32>
    %c0_2 = arith.constant 0 : index
    %c0_3 = arith.constant 0 : index
    %c0_4 = arith.constant 0 : index
    %2 = vector.load %arg3[%c0_2, %c0_3, %c0_4] : memref<1x1x64xf32, #tpu.memory_space<vmem>>, vector<1x1x64xf32>
    %3 = vector.shape_cast %2 : vector<1x1x64xf32> to vector<1x64xf32>
    %4 = tpu.iota {dimensions = array<i32: 1>} : vector<1x64xi32>
    %cst = arith.constant 1.000000e+10 : f32
    %5 = vector.broadcast %cst : f32 to vector<1x64xf32>
    %c0_5 = arith.constant 0 : index
    %c0_6 = arith.constant 0 : index
    %6 = vector.load %arg5[%c0_5, %c0_6] : memref<1x64xf32, #tpu.memory_space<vmem>>, vector<1x64xf32>
    tpu.vector_store %arg5[%c0_5, %c0_6], %5 {strides = array<i32>} : memref<1x64xf32, #tpu.memory_space<vmem>>, vector<1x64xf32>,
    %c0_7 = arith.constant 0 : index
    %c0_8 = arith.constant 0 : index
    %c0_9 = arith.constant 0 : index
    %7 = vector.load %arg1[%c0_7, %c0_8, %c0_9] : memref<1x1x1xi32, #tpu.memory_space<vmem>>, vector<1x1x1xi32>
    %8 = vector.shape_cast %7 : vector<1x1x1xi32> to vector<1x1xi32>
    %c0_i32 = arith.constant 0 : i32
    %c16_i32 = arith.constant 16 : i32
    %9 = arith.addi %c0_i32, %c16_i32 : i32
    %c1_i32 = arith.constant 1 : i32
    %10 = scf.for %arg6 = %c0_i32 to %9 step %c1_i32 iter_args(%arg7 = %8) -> (vector<1x1xi32>)  : i32 {
      %c0_11 = arith.constant 0 : index
      %11 = arith.index_cast %arg6 : i32 to index
      %c0_12 = arith.constant 0 : index
      %12 = vector.load %arg4[%c0_11, %11, %c0_12] : memref<1x16x1xi32, #tpu.memory_space<vmem>>, vector<1x1x1xi32>
      %13 = vector.shape_cast %12 : vector<1x1x1xi32> to vector<1x1xi32>
      %14 = vector.shape_cast %arg7 : vector<1x1xi32> to vector<1x1x1xi32>
      tpu.vector_store %arg4[%c0_11, %11, %c0_12], %14 {strides = array<i32>} : memref<1x16x1xi32, #tpu.memory_space<vmem>>, vector<1x1x1xi32>,
      %15 = vector.broadcast %arg7 : vector<1x1xi32> to vector<1x64xi32>
      %16 = arith.cmpi eq, %4, %15 : vector<1x64xi32>
      %cst_13 = arith.constant 0.000000e+00 : f32
      %17 = vector.shape_cast %16 : vector<1x64xi1> to vector<1x64xi1>
      %18 = vector.broadcast %17 : vector<1x64xi1> to vector<8x64xi1>
      %19 = vector.broadcast %cst_13 : f32 to vector<8x64xf32>
      %20 = arith.select %18, %1, %19 : vector<8x64xi1>, vector<8x64xf32>
      %cst_14 = arith.constant dense<0.000000e+00> : vector<8xf32>
      %21 = vector.multi_reduction <add>, %20, %cst_14 [1] : vector<8x64xf32> to vector<8xf32>
      %22 = vector.shape_cast %21 : vector<8xf32> to vector<8x1xf32>
      %23 = vector.broadcast %22 : vector<8x1xf32> to vector<8x64xf32>
      %24 = arith.mulf %23, %1 : vector<8x64xf32>
      %cst_15 = arith.constant dense<0.000000e+00> : vector<64xf32>
      %25 = vector.multi_reduction <add>, %24, %cst_15 [0] : vector<8x64xf32> to vector<64xf32>
      %26 = vector.shape_cast %25 : vector<64xf32> to vector<1x64xf32>
      %27 = arith.mulf %22, %22 : vector<8x1xf32>
      %cst_16 = arith.constant dense<0.000000e+00> : vector<1xf32>
      %28 = vector.multi_reduction <add>, %27, %cst_16 [0] : vector<8x1xf32> to vector<1xf32>
      %29 = vector.shape_cast %28 : vector<1xf32> to vector<1x1xf32>
      %cst_17 = arith.constant 2.000000e+00 : f32
      %30 = vector.broadcast %cst_17 : f32 to vector<1x64xf32>
      %31 = arith.mulf %30, %26 : vector<1x64xf32>
      %32 = arith.subf %3, %31 : vector<1x64xf32>
      %33 = vector.broadcast %29 : vector<1x1xf32> to vector<1x64xf32>
      %34 = arith.addf %32, %33 : vector<1x64xf32>
      %c0_18 = arith.constant 0 : index
      %c0_19 = arith.constant 0 : index
      %35 = vector.load %arg5[%c0_18, %c0_19] : memref<1x64xf32, #tpu.memory_space<vmem>>, vector<1x64xf32>
      %36 = arith.minimumf %35, %34 : vector<1x64xf32>
      %c0_20 = arith.constant 0 : index
      %c0_21 = arith.constant 0 : index
      %37 = vector.load %arg5[%c0_20, %c0_21] : memref<1x64xf32, #tpu.memory_space<vmem>>, vector<1x64xf32>
      tpu.vector_store %arg5[%c0_20, %c0_21], %36 {strides = array<i32>} : memref<1x64xf32, #tpu.memory_space<vmem>>, vector<1x64xf32>,
      %cst_22 = arith.constant dense<0xFF800000> : vector<1xf32>
      %38 = vector.multi_reduction <maximumf>, %36, %cst_22 [1] : vector<1x64xf32> to vector<1xf32>
      %39 = vector.shape_cast %38 : vector<1xf32> to vector<1x1xf32>
      %40 = vector.broadcast %39 : vector<1x1xf32> to vector<1x64xf32>
      %41 = arith.cmpf oeq, %36, %40 : vector<1x64xf32>
      %c64_i32 = arith.constant 64 : i32
      %42 = vector.broadcast %c64_i32 : i32 to vector<1x64xi32>
      %43 = arith.select %41, %4, %42 : vector<1x64xi1>, vector<1x64xi32>
      %cst_23 = arith.constant dense<2147483647> : vector<1xi32>
      %44 = vector.multi_reduction <minsi>, %43, %cst_23 [1] : vector<1x64xi32> to vector<1xi32>
      %45 = vector.shape_cast %44 : vector<1xi32> to vector<1x1xi32>
      scf.yield %45 : vector<1x1xi32>
    }
    %c16_i32_10 = arith.constant 16 : i32
    return
  }
  func.func @transform_0(%arg0: i32) -> (i32, i32, i32) {
    %c0_i32 = arith.constant 0 : i32
    %c0_i32_0 = arith.constant 0 : i32
    %c0_i32_1 = arith.constant 0 : i32
    return %arg0, %c0_i32, %c0_i32_0 : i32, i32, i32
  }
  func.func @transform_1(%arg0: i32) -> (i32, i32, i32) {
    %c0_i32 = arith.constant 0 : i32
    %c0_i32_0 = arith.constant 0 : i32
    %c0_i32_1 = arith.constant 0 : i32
    return %arg0, %c0_i32, %c0_i32_0 : i32, i32, i32
  }
  func.func @transform_2(%arg0: i32) -> (i32, i32, i32) {
    %c0_i32 = arith.constant 0 : i32
    %c0_i32_0 = arith.constant 0 : i32
    %c0_i32_1 = arith.constant 0 : i32
    return %arg0, %c0_i32, %c0_i32_0 : i32, i32, i32
  }
  func.func @transform_3(%arg0: i32) -> (i32, i32, i32) {
    %c0_i32 = arith.constant 0 : i32
    %c0_i32_0 = arith.constant 0 : i32
    %c0_i32_1 = arith.constant 0 : i32
    return %arg0, %c0_i32, %c0_i32_0 : i32, i32, i32
  }
}

</mosaic_0001>

<bundles_post_ra>
// kernel: tpu_custom_call.1
= control target key start
LH: loop header
LB: loop body
LE: loop exit
PB: predicated region body
PF: predicated region fallthrough
CT: control target
= control target key end

     0   :  { %8 = vsyncpa [#allocation4], 0  ;;  %s688_s0 = inlined_call_operand.vmem [shape: s32[2,1,1], index: 0, kind: input, shape index: {}]   ;;  %s689_s1 = inlined_call_operand.hbm [shape: f32[2,8,64], index: 1, kind: input, shape index: {}]   ;;  %s690_s2 = inlined_call_operand.vmem [shape: f32[2,1,64], index: 2, kind: input, shape index: {}]   ;;  %s691_s3 = inlined_call_operand.vmem [shape: s32[2,16,1], index: 3, kind: output, shape index: {}]  }
   0x1   :  { %10 = vsyncpa [#allocation4 + $0x1], 0  ;;  %s556_s12 = smov 0   ;;  %s558_s13 = smov 0  }
   0x2   :  { %s560_s14 = smov 0   ;;  %s562_s15 = smov 0  }
   0x3 LB: > { %s575_s16 = sadd.s32 4294967295, %s524_s15   ;;  %s578_s17 = sadd.s32 1, %s524_s15   ;;  %s524_s15 = sphi %s562_s15, %s698_s15   ;;  %s520_s14 = sphi %s560_s14, %s697_s14   ;;  %s516_s13 = sphi %s558_s13, %s696_s13   ;;  %s512_s12 = sphi %s556_s12, %s695_s12  }
   0x4   : > { %s46_s18 = ssub.s32 %s524_s15, %s578_s17  ;;  %s49_s19 = sadd.s32 1, %s520_s14 }
   0x5   : > { %p47_p0 = scmp.eq.s32.totalorder %s46_s18, 0  ;;  %p56_p1 = scmp.ne.s32.totalorder %s520_s14, %s516_s13 }
   0x6   : > { %p57_p2 = scmp.eq.s32.totalorder %s524_s15, 0  ;;  %p62_p3 = scmp.ne.s32.totalorder %s516_s13, %s512_s12 }
   0x7   : > { %s588_s20 = scalar_select %p47_p0, %s520_s14, %s49_s19  }
   0x8   : > { %p590_p4 = por %p57_p2, %p56_p1  ;;  %p63_p5 = scmp.eq.s32.totalorder %s575_s16, 0 }
   0x9   : > { %p400_p6 = scmp.lt.s32.totalorder %s524_s15, 2  ;;  %s144_s23 = sand.u32 1, %s520_s14  }
   0xa   : > { %p596_p7 = por %p63_p5, %p62_p3  ;;  %s385_s24 = sshll.u32 %s144_s23, 3 }
   0xb   : > { %s386_s25 = sshll.u32 %s524_s15, 3  ;;  %s148_s29 = scalar_lea.vmem [#allocation3], %s385_s24 }
   0xc   : > { %s152_s28 = scalar_lea.hbm %s689_s1, %s386_s25  ;;  %s156_s30 = sshll.u32 %s148_s29, 4  ;;  %s157_s30 = int_to_ptr.vmem [resolvable:$true] %s156_s30 }
   0xd   : > { %s154_s4 = sshll.u32 %s152_s28, 4  ;;  %p607_p8 = pnand %p400_p6, %p590_p4  ;;  %s155_s4 = int_to_ptr.hbm [resolvable:$true] %s154_s4 }
   0xe   : > { %p387_p9 = scmp.ge.s32.totalorder %s524_s15, 1  ;;  %p167_p10 = scmp.lt.s32.totalorder %s524_s15, 3 }
   0xf   : > { %s145_s6 = scalar_lea.sflag [#allocation4], %s144_s23  ;;  %s452_s7 = sshra.s32 %s155_s4, 4  ;;  %s453_s7 = int_to_ptr.hbm [resolvable:$true] %s452_s7 }
  0x10   : > { %s454_s8 = scalar_lea.hbm %s453_s7, 8  ;;  %p456_p12 = pneg %p607_p8 }
  0x11   : > { %p455_p11 = scmp.ne.s32.totalorder %s453_s7, %s454_s8  ;;  %s459_s11 = scalar_lea.hbm %s689_s1, 16 }
  0x12   : > { %p460_p1 = scmp.lt.s32.totalorder %s453_s7, %s689_s1  ;;  %p461_p2 = scmp.lt.s32.totalorder %s459_s11, %s454_s8 }
  0x13   : > { %p457_p13 = pnand %p456_p12, %p455_p11 }
  0x14   : > { %p462_p3 = por %p461_p2, %p460_p1 }
  0x15   : > { %p458_p0 = pneg %p457_p13 }
  0x17   : > { %p463_p4 = pnand %p462_p3, %p458_p0 }
  0x19   : > { %466 = shalt.err (!%p463_p4)
}
  0x1a   : > { %399 = dma.hbm_to_vmem [thread:$0]  (!%p607_p8), %s155_s4, 128, %s157_s30, %s145_s6  }
  0x1b   : > { %p168_p5 = pnand %p387_p9, %p167_p10 }
  0x1c   : > { %s173_s19 = sand.u32 (!%p168_p5), 1, %s516_s13  }
  0x1d   : > { %171 = sbr.rel (%p168_p5) target bundleno = 665 (0x299), region = 32  ;;  %s388_s21 = sshll.u32 (!%p168_p5), %s173_s19, 3 }
  0x1e   : > { %s174_s23 = scalar_lea.sflag (!%p168_p5), [#allocation4], %s173_s19  ;;  %s177_s24 = scalar_lea.vmem (!%p168_p5), [#allocation3], %s388_s21 }
  0x22   : > { %507 = dma.done.wait (%p596_p7), %s174_s23, 128  }
  0x23   : > { %509 = vsyncadd (%p596_p7), %s174_s23, 4294967168  ;;  %p207_p6 = scmp.lt.s32.totalorder %s575_s16, 1  ;;  %v220_v0 = vlaneseq  ;;  %vm222_vm0 = vcmask 516096   ;;  %v534_v1 = vmov 1e+10   ;;  %v648_v3 = vld [vmem:[%s177_s24] sm:$0xff] }
  0x24   : > { %223 = vst.msk [vmem:[#allocation2] sm:$0x1] %vm222_vm0, %v534_v1  ;;  %s654_s6 = smov 0  }
  0x25   : > { %s700_s16 = smov (!%p207_p6, %s575_s16), 1  ;;  %v635_v2 = vand.u32 127, %v220_v0 }
  0x26   : > { %s209_s26 = scalar_lea.vmem %s688_s0, %s700_s16  ;;  %s212_s22 = scalar_lea.vmem %s690_s2, %s700_s16 }
  0x27   : > { %s393_s29 = sshll.u32 %s700_s16, 4  ;;  %v650_v4 = vld [vmem:[%s212_s22] sm:$0x1] }
  0x28   : > { %s646_s5 = scalar_lea.vmem %s691_s3, %s393_s29  ;;  %v224_v5 = vld [vmem:[%s209_s26] sm:$0x1]  }
  0x29 LB: >> { %vm233_vm1 = vcmask 0   ;;  %v535_v6 = vmov 0   ;;  %s232_s16 = scalar_lea.vmem %s646_s5, %s532_s6  ;;  %vm243_vm3 = vcmask 523264   ;;  %s230_s6 = sadd.s32 1, %s532_s6   ;;  %s532_s6 = sphi %s654_s6, %s230_s6   ;;  %v528_v5 = vphi %v224_v5, %v287_v5  }
  0x2a   : >> { %451 = vset.pattern.permute.xlu0 %v535_v6  ;;  %234 = vst.msk [vmem:[%s232_s16] sm:$0x1] %vm233_vm1, %v528_v5  ;;  %p227_p7 = scmp.ge.s32.totalorder %s230_s6, 16  }
  0x2b   : >> { %236 = vperm.xlu0 %451, %v528_v5   ;;  %v265_v30 = vld [vmem:[#allocation2] sm:$0x1] }
  0x9d   : >> { %v237_v7 = vpop.permute.xlu0 %236 }
  0x9e   : >> { %vm238_vm2 = vcmp.eq.s32.totalorder %v635_v2, %v237_v7 }
  0x9f   : >> { %v239_v8 = vsel %vm238_vm2, 1, %v535_v6 }
  0xa0   : >> { %v240_v9 = vperm.slane %v239_v8, 0 }
  0xa2   : >> { %vm241_vm4 = vcmp.eq.s32.totalorder %v240_v9, 1 }
  0xa3   : >> { %v242_v10 = vsel %vm241_vm4, %v648_v3, 0.0 }
  0xa4   : >> { %v244_v11 = vsel %vm243_vm3, %v242_v10, 0.0 }
  0xa5   : >> { %245 = vadd.xlane.f32.xlu0 %v244_v11 }
 0x118   : >> { %v246_v12 = vpop.xlane.xlu0 %245 }
 0x119   : >> { %v247_v13 = vmul.f32 %v246_v12, %v648_v3  ;;  %v255_v14 = vmul.f32 %v246_v12, %v246_v12 }
 0x11b   : >> { %v248_v15 = vsel %vm243_vm3, %v247_v13, 0.0  ;;  %v256_v16 = vrot.slane %v255_v14, 4 }
 0x11c   : >> { %v249_v17 = vrot.slane %v248_v15, 4 }
 0x11d   : >> { %v257_v18 = vadd.f32 %v256_v16, %v255_v14 }
 0x11e   : >> { %v250_v19 = vadd.f32 %v249_v17, %v248_v15 }
 0x11f   : >> { %v258_v20 = vrot.slane %v257_v18, 2 }
 0x120   : >> { %v251_v21 = vrot.slane %v250_v19, 2 }
 0x121   : >> { %v259_v23 = vadd.f32 %v258_v20, %v257_v18 }
 0x122   : >> { %v252_v22 = vadd.f32 %v251_v21, %v250_v19 }
 0x123   : >> { %v260_v26 = vrot.slane %v259_v23, 1 }
 0x124   : >> { %v253_v24 = vrot.slane %v252_v22, 1 }
 0x125   : >> { %v261_v28 = vadd.f32 %v260_v26, %v259_v23 }
 0x126   : >> { %v254_v25 = vadd.f32 %v253_v24, %v252_v22 }
 0x128   : >> { %v262_v27 = vmul.f32 2.0, %v254_v25 }
 0x12a   : >> { %v263_v29 = vsub.f32 %v650_v4, %v262_v27 }
 0x12c   : >> { %v264_v31 = vadd.f32 %v263_v29, %v261_v28 }
 0x12e   : >> { %v266_v32 = vmin.f32 %v265_v30, %v264_v31 }
 0x130   : >> { %v268_v33 = vsel %vm222_vm0, %v266_v32, -inf  ;;  %267 = vst.msk [vmem:[#allocation2] sm:$0x1] %vm222_vm0, %v266_v32 }
 0x131   : >> { %269 = vmax.xlane.f32.xlu1 %v268_v33 }
 0x1a4   : >> { %v270_v34 = vpop.xlane.xlu1 %269 }
 0x1a5   : >> { %vm271_vm5 = vcmp.eq.f32.partialorder %v266_v32, %v270_v34 }
 0x1a6   : >> { %v272_v35 = vsel %vm271_vm5, %v635_v2, 64 }
 0x1a7   : >> { %v273_v36 = vsel %vm222_vm0, %v272_v35, 2147483647 }
 0x1a8   : >> { %v275_v37 = vshra.s32 %v273_v36, 16  ;;  %v274_v39 = vand.u32 65535, %v273_v36 }
 0x1aa   : >> { %v277_v38 = vcvt.s32.f32 %v275_v37  ;;  %v276_v41 = vcvt.s32.f32 %v274_v39 }
 0x1ac   : >> { %278 = vmin.xlane.f32.xlu1 %v277_v38 }
 0x21f   : >> { %v279_v40 = vpop.xlane.xlu1 %278 }
 0x220   : >> { %vm280_vm6 = vcmp.eq.f32.partialorder %v277_v38, %v279_v40  ;;  %v285_v43 = vcvt.f32.s32 %v279_v40 }
 0x221   : >> { %v281_v42 = vsel %vm280_vm6, %v276_v41, inf }
 0x222   : >> { %282 = vmin.xlane.f32.xlu2 %v281_v42  ;;  %v286_v45 = vshll.u32 %v285_v43, 16 }
 0x294   : > { %229 = sbr.rel (!%p227_p7) target bundleno = 41 (0x29), region = 86 }
 0x295   : >> { %v283_v44 = vpop.xlane.xlu2 %282 }
 0x296   : >> { %v284_v46 = vcvt.f32.s32 %v283_v44 }
 0x298   : >> { %v287_v5 = vadd.s32 %v286_v45, %v284_v46  }
 0x299 PF: > { %p13_p8 = scmp.ge.s32.totalorder %s578_s17, 4   ;;  %s695_s12 = smov %s516_s13 }
 0x29a   : > { %s696_s13 = smov %s520_s14  ;;  %s697_s14 = smov %s588_s20 }
 0x29b   : > { %s698_s15 = smov %s578_s17  ;;  %15 = sbr.rel (!%p13_p8) target bundleno = 3 (0x3), region = 97 }
 0x2a0   :  { %309 = vsyncpa [#allocation4], 1 }
 0x2a1   :  { %311 = vsyncpa [#allocation4 + $0x1], 1 }

</bundles_post_ra>
